<compile_context>
chip_gen: v5e
topology: v5e:2x2
jax: 0.10.0
libtpu: 0.0.40
codegen_flags: <defaults>
</compile_context>

<pallas_src>
import functools

import jax
import jax.numpy as jnp
from jax.experimental import pallas as pl
from jax.experimental.pallas import tpu as pltpu


def _cdiv(a, b):
    return (a + b - 1) // b


def _round_up(x, m):
    return _cdiv(x, m) * m


def _choose_tile(n, max_tile):
    """Token-tile length: either the whole axis, or a multiple of 128 that divides
    the (padded) token axis."""
    if n <= max_tile:
        return n, n                                   # block == full dim is allowed
    cap = max(128, (max_tile // 128) * 128)
    n_tiles = _cdiv(n, cap)
    tile = _round_up(_cdiv(n, n_tiles), 128)
    return tile, n_tiles * tile


def _make_kernel(num_layers, num_fourier_features, input_dim, film_offsets, mm_dtype):
    """Kernel over one (batch element, token tile): fourier-folded layer 0 + FiLM stack.

    All activations live as (features, tokens): tokens on the 128-lane axis.
    """
    nf_pairs = num_fourier_features // 2
    D = input_dim

    def kernel(h_ref, gamma_ref, beta_ref, *rest):
        out_ref = rest[-1]
        w_refs = rest[:-1]                                  # W_l^T, shape (dout_l, din_l)

        ht = h_ref[...].astype(jnp.float32)                 # (D, T), lane-dense

        # ---- layer 0: Fourier expansion folded into column blocks of W0^T ----
        w0 = w_refs[0]                                      # (h0, D*(1+nf)) in mm_dtype

        def _dot0(col, comp):
            return jnp.dot(w0[:, col:col + D], comp.astype(mm_dtype),
                           preferred_element_type=jnp.float32)

        lin = _dot0(0, ht)
        for i in range(nf_pairs):
            freq = 2.0 ** i
            lin = lin + _dot0(D * (2 * i + 1), jnp.sin(freq * ht))
            lin = lin + _dot0(D * (2 * i + 2), jnp.cos(freq * ht))

        # ---- FiLM layer stack (gamma/beta precomputed per batch, bias folded) ----
        x = None
        for l in range(num_layers):
            if l > 0:
                lin = jnp.dot(w_refs[l][...], x.astype(mm_dtype),
                              preferred_element_type=jnp.float32)   # (dout, T)
            off, dout = film_offsets[l]
            g = gamma_ref[off:off + dout, :]                # (dout, 1) -> lane broadcast
            bt = beta_ref[off:off + dout, :]                # (dout, 1), linear bias folded
            x = g * lin + bt                                # elementwise in f32
            if l < num_layers - 1:
                x = jnp.tanh(x)

        out_ref[...] = x.astype(out_ref.dtype)              # (out_dim, T), lane-dense store

    return kernel


def init_params(key, input_dim, condition_dim, hidden_dims, num_fourier_features):
    """Deterministic synthetic FiLM parameters (PyTorch-Linear-style uniform init)."""
    fourier_dim = input_dim + input_dim * num_fourier_features
    dim_list = [fourier_dim] + list(hidden_dims) + [input_dim]
    cdim = condition_dim + 1
    params = []
    for i in range(len(dim_list) - 1):
        din, dout = dim_list[i], dim_list[i + 1]
        key, k0, k1, k2, k3, k4, k5 = jax.random.split(key, 7)
        s = 1.0 / jnp.sqrt(din)
        sc = 1.0 / jnp.sqrt(cdim)
        w = jax.random.uniform(k0, (din, dout), jnp.float32, -s, s)
        b = jax.random.uniform(k1, (1, dout), jnp.float32, -s, s)
        wg = jax.random.uniform(k2, (cdim, dout), jnp.float32, -sc, sc)
        bg = jax.random.uniform(k3, (1, dout), jnp.float32, -sc, sc)
        wb = jax.random.uniform(k4, (cdim, dout), jnp.float32, -sc, sc)
        bb = jax.random.uniform(k5, (1, dout), jnp.float32, -sc, sc)
        params.append((w, b, wg, bg, wb, bb))
    return params


@functools.partial(jax.jit,
                   static_argnames=("num_fourier_features", "tile_n", "matmul_dtype"))
def ode_func_forward(t, h, scene_context, params, *,
                     num_fourier_features, tile_n=1024, matmul_dtype=jnp.bfloat16):
    """Pallas implementation of ODEFunc.forward(t, (h, scene_context)) for scalar t."""
    B, N, D = h.shape
    num_layers = len(params)

    # ---- FiLM conditioning hoisted out of the kernel (once per batch element) ----
    t_col = jnp.full((B, 1), t, dtype=jnp.float32)
    ctx = jnp.concatenate([t_col, scene_context.astype(jnp.float32)], axis=-1)  # (B, C+1)

    gammas, betas, wts, film_offsets = [], [], [], []
    off = 0
    for (w, b, wg, bg, wb, bb) in params:
        dout = w.shape[1]
        g = ctx @ wg + bg                              # (B, dout)
        bt = g * b + (ctx @ wb + bb)                   # fold linear bias into beta
        gammas.append(g)
        betas.append(bt)
        wts.append(w.T.astype(matmul_dtype))           # (dout, din), MXU-ready
        film_offsets.append((off, dout))
        off += dout
    G = off
    gamma_all = jnp.concatenate(gammas, axis=-1)[..., None]   # (B, G, 1)
    beta_all = jnp.concatenate(betas, axis=-1)[..., None]     # (B, G, 1)

    # ---- lane-dense data layout: tokens on the 128-lane axis ----
    tile, n_pad = _choose_tile(N, tile_n)
    h_t = jnp.transpose(h, (0, 2, 1)).astype(jnp.float32)     # (B, D, N)
    if n_pad != N:
        h_t = jnp.pad(h_t, ((0, 0), (0, 0), (0, n_pad - N)))

    out_dim = params[-1][0].shape[1]
    kernel = _make_kernel(num_layers, num_fourier_features, D,
                          tuple(film_offsets), matmul_dtype)

    in_specs = [
        pl.BlockSpec((None, D, tile), lambda b, j: (b, 0, j)),   # h^T tile (lane-dense)
        pl.BlockSpec((None, G, 1), lambda b, j: (b, 0, 0)),      # gamma (per batch)
        pl.BlockSpec((None, G, 1), lambda b, j: (b, 0, 0)),      # beta  (per batch)
    ]
    for wt in wts:                                               # resident weights
        in_specs.append(pl.BlockSpec(wt.shape, lambda b, j: (0, 0)))

    out_t = pl.pallas_call(
        kernel,
        out_shape=jax.ShapeDtypeStruct((B, out_dim, n_pad), h.dtype),
        grid_spec=pltpu.PrefetchScalarGridSpec(
            num_scalar_prefetch=0,
            grid=(B, n_pad // tile),
            in_specs=in_specs,
            out_specs=pl.BlockSpec((None, out_dim, tile), lambda b, j: (b, 0, j)),
        ),
        compiler_params=pltpu.CompilerParams(
            dimension_semantics=("parallel", "parallel")),
    )(h_t, gamma_all, beta_all, *wts)

    h_dot = jnp.transpose(out_t[:, :, :N], (0, 2, 1))            # back to (B, N, out_dim)
    # TODO(synk): per-token t tensors and the scene_context=None branch of the torch
    # module are not implemented (scalar t + context assumed, as in ODE solvers);
    # requires_grad_(True) on the returned zeros has no JAX equivalent.
    return h_dot, jnp.zeros_like(scene_context)


def _reference_forward(t, h, scene_context, params, num_fourier_features):
    """Plain-JAX reference mirroring the PyTorch module, for correctness check."""
    B, N, D = h.shape
    enc = [h]
    for i in range(num_fourier_features // 2):
        freq = 2.0 ** i
        enc.append(jnp.sin(freq * h))
        enc.append(jnp.cos(freq * h))
    x = jnp.concatenate(enc, axis=-1)                         # (B, N, fourier_dim)
    t_exp = jnp.full((B, N, 1), t, dtype=h.dtype)
    sc = jnp.broadcast_to(scene_context[:, None, :], (B, N, scene_context.shape[-1]))
    ctx = jnp.concatenate([t_exp, sc], axis=-1)               # (B, N, C+1)
    for l, (w, b, wg, bg, wb, bb) in enumerate(params):
        lin = x @ w + b
        gamma = ctx @ wg + bg
        beta = ctx @ wb + bb
        x = gamma * lin + beta
        if l < len(params) - 1:
            x = jnp.tanh(x)
    return x, jnp.zeros_like(scene_context)


if __name__ == "__main__":
    # Small shapes consistent with the module's forward.
    B, N = 2, 8
    input_dim = 4
    condition_dim = 8
    hidden_dims = (32, 32)
    num_fourier_features = 4   # even; fourier_expanded_dim = 4 + 4*4 = 20

    key = jax.random.PRNGKey(0)
    kh, kc, kp, kh2 = jax.random.split(key, 4)
    h = jax.random.normal(kh, (B, N, input_dim), jnp.float32)
    scene_context = jax.random.normal(kc, (B, condition_dim), jnp.float32)
    t = jnp.float32(0.5)       # scalar time (torch `len(t.shape) == 0` branch)

    params = init_params(kp, input_dim, condition_dim, hidden_dims, num_fourier_features)
    ref_h_dot, _ = _reference_forward(t, h, scene_context, params, num_fourier_features)

    # 1) exact-math path (f32 matmuls) at the module's small shapes
    h_dot, sc_zero = ode_func_forward(
        t, h, scene_context, params,
        num_fourier_features=num_fourier_features, matmul_dtype=jnp.float32)
    jax.block_until_ready(h_dot)
    jax.block_until_ready(sc_zero)
    assert h_dot.shape == (B, N, input_dim)
    assert sc_zero.shape == scene_context.shape
    assert jnp.allclose(h_dot, ref_h_dot, rtol=1e-4, atol=1e-4)
    assert jnp.all(sc_zero == 0)

    # 2) default fast path (bf16 MXU inputs, f32 accumulate) — loose sanity check
    h_dot_bf16, _ = ode_func_forward(
        t, h, scene_context, params, num_fourier_features=num_fourier_features)
    jax.block_until_ready(h_dot_bf16)
    assert jnp.allclose(h_dot_bf16, ref_h_dot, rtol=1e-1, atol=1e-1)

    # 3) multi-tile + padded token axis (N=300 -> tile 128, padded to 384, grid (2,3))
    N2 = 300
    h2 = jax.random.normal(kh2, (B, N2, input_dim), jnp.float32)
    h_dot2, _ = ode_func_forward(
        t, h2, scene_context, params,
        num_fourier_features=num_fourier_features, tile_n=128, matmul_dtype=jnp.float32)
    jax.block_until_ready(h_dot2)
    ref2, _ = _reference_forward(t, h2, scene_context, params, num_fourier_features)
    assert h_dot2.shape == (B, N2, input_dim)
    assert jnp.allclose(h_dot2, ref2, rtol=1e-4, atol=1e-4)

    print("KERNEL_OK")
</pallas_src>

<mosaic_0001>
module attributes {stable_mosaic.version = 11 : i64} {
  func.func @kernel(%arg0: i32, %arg1: i32, %arg2: memref<1x4x8xf32, #tpu.memory_space<vmem>>, %arg3: memref<1x68x1xf32, #tpu.memory_space<vmem>>, %arg4: memref<1x68x1xf32, #tpu.memory_space<vmem>>, %arg5: memref<32x20xf32, #tpu.memory_space<vmem>>, %arg6: memref<32x32xf32, #tpu.memory_space<vmem>>, %arg7: memref<4x32xf32, #tpu.memory_space<vmem>>, %arg8: memref<1x4x8xf32, #tpu.memory_space<vmem>>) attributes {dimension_semantics = [#tpu.dimension_semantics<parallel>, #tpu.dimension_semantics<parallel>], iteration_bounds = array<i64: 2, 1>, scalar_prefetch = 0 : i64, scratch_operands = 0 : i64, tpu.core_type = #tpu.core_type<tc>, window_params = [{transform_indices = @transform_0, window_bounds = array<i64: 1, 4, 8>}, {transform_indices = @transform_1, window_bounds = array<i64: 1, 68, 1>}, {transform_indices = @transform_2, window_bounds = array<i64: 1, 68, 1>}, {pipeline_mode = #tpu.pipeline_mode<synchronous>, transform_indices = @transform_3, window_bounds = array<i64: 32, 20>}, {pipeline_mode = #tpu.pipeline_mode<synchronous>, transform_indices = @transform_4, window_bounds = array<i64: 32, 32>}, {pipeline_mode = #tpu.pipeline_mode<synchronous>, transform_indices = @transform_5, window_bounds = array<i64: 4, 32>}, {transform_indices = @transform_6, window_bounds = array<i64: 1, 4, 8>}]} {
    %c0 = arith.constant 0 : index
    %c0_0 = arith.constant 0 : index
    %c0_1 = arith.constant 0 : index
    %0 = vector.load %arg2[%c0, %c0_0, %c0_1] : memref<1x4x8xf32, #tpu.memory_space<vmem>>, vector<1x4x8xf32>
    %1 = vector.shape_cast %0 : vector<1x4x8xf32> to vector<4x8xf32>
    %c0_2 = arith.constant 0 : index
    %c0_3 = arith.constant 0 : index
    %2 = vector.load %arg5[%c0_2, %c0_3] : memref<32x20xf32, #tpu.memory_space<vmem>>, vector<32x4xf32>
    %cst = arith.constant dense<0.000000e+00> : vector<32x8xf32>
    %3 = tpu.matmul %2, %1, %cst {dimension_numbers = #tpu.dot_dimension_numbers<[1], [0], [0], [1], [0, 0, 1, 1], [], []>} : vector<32x4xf32>, vector<4x8xf32>, vector<32x8xf32> -> vector<32x8xf32>
    %cst_4 = arith.constant 1.000000e+00 : f32
    %4 = vector.broadcast %cst_4 : f32 to vector<4x8xf32>
    %5 = arith.mulf %4, %1 : vector<4x8xf32>
    %6 = math.sin %5 : vector<4x8xf32>
    %c0_5 = arith.constant 0 : index
    %c4 = arith.constant 4 : index
    %7 = vector.load %arg5[%c0_5, %c4] : memref<32x20xf32, #tpu.memory_space<vmem>>, vector<32x4xf32>
    %cst_6 = arith.constant dense<0.000000e+00> : vector<32x8xf32>
    %8 = tpu.matmul %7, %6, %cst_6 {dimension_numbers = #tpu.dot_dimension_numbers<[1], [0], [0], [1], [0, 0, 1, 1], [], []>} : vector<32x4xf32>, vector<4x8xf32>, vector<32x8xf32> -> vector<32x8xf32>
    %9 = arith.addf %3, %8 : vector<32x8xf32>
    %cst_7 = arith.constant 1.000000e+00 : f32
    %10 = vector.broadcast %cst_7 : f32 to vector<4x8xf32>
    %11 = arith.mulf %10, %1 : vector<4x8xf32>
    %12 = math.cos %11 : vector<4x8xf32>
    %c0_8 = arith.constant 0 : index
    %c8 = arith.constant 8 : index
    %13 = vector.load %arg5[%c0_8, %c8] : memref<32x20xf32, #tpu.memory_space<vmem>>, vector<32x4xf32>
    %cst_9 = arith.constant dense<0.000000e+00> : vector<32x8xf32>
    %14 = tpu.matmul %13, %12, %cst_9 {dimension_numbers = #tpu.dot_dimension_numbers<[1], [0], [0], [1], [0, 0, 1, 1], [], []>} : vector<32x4xf32>, vector<4x8xf32>, vector<32x8xf32> -> vector<32x8xf32>
    %15 = arith.addf %9, %14 : vector<32x8xf32>
    %cst_10 = arith.constant 2.000000e+00 : f32
    %16 = vector.broadcast %cst_10 : f32 to vector<4x8xf32>
    %17 = arith.mulf %16, %1 : vector<4x8xf32>
    %18 = math.sin %17 : vector<4x8xf32>
    %c0_11 = arith.constant 0 : index
    %c12 = arith.constant 12 : index
    %19 = vector.load %arg5[%c0_11, %c12] : memref<32x20xf32, #tpu.memory_space<vmem>>, vector<32x4xf32>
    %cst_12 = arith.constant dense<0.000000e+00> : vector<32x8xf32>
    %20 = tpu.matmul %19, %18, %cst_12 {dimension_numbers = #tpu.dot_dimension_numbers<[1], [0], [0], [1], [0, 0, 1, 1], [], []>} : vector<32x4xf32>, vector<4x8xf32>, vector<32x8xf32> -> vector<32x8xf32>
    %21 = arith.addf %15, %20 : vector<32x8xf32>
    %cst_13 = arith.constant 2.000000e+00 : f32
    %22 = vector.broadcast %cst_13 : f32 to vector<4x8xf32>
    %23 = arith.mulf %22, %1 : vector<4x8xf32>
    %24 = math.cos %23 : vector<4x8xf32>
    %c0_14 = arith.constant 0 : index
    %c16 = arith.constant 16 : index
    %25 = vector.load %arg5[%c0_14, %c16] : memref<32x20xf32, #tpu.memory_space<vmem>>, vector<32x4xf32>
    %cst_15 = arith.constant dense<0.000000e+00> : vector<32x8xf32>
    %26 = tpu.matmul %25, %24, %cst_15 {dimension_numbers = #tpu.dot_dimension_numbers<[1], [0], [0], [1], [0, 0, 1, 1], [], []>} : vector<32x4xf32>, vector<4x8xf32>, vector<32x8xf32> -> vector<32x8xf32>
    %27 = arith.addf %21, %26 : vector<32x8xf32>
    %c0_16 = arith.constant 0 : index
    %c0_17 = arith.constant 0 : index
    %c0_18 = arith.constant 0 : index
    %28 = vector.load %arg3[%c0_16, %c0_17, %c0_18] : memref<1x68x1xf32, #tpu.memory_space<vmem>>, vector<1x32x1xf32>
    %29 = vector.shape_cast %28 : vector<1x32x1xf32> to vector<32x1xf32>
    %c0_19 = arith.constant 0 : index
    %c0_20 = arith.constant 0 : index
    %c0_21 = arith.constant 0 : index
    %30 = vector.load %arg4[%c0_19, %c0_20, %c0_21] : memref<1x68x1xf32, #tpu.memory_space<vmem>>, vector<1x32x1xf32>
    %31 = vector.shape_cast %30 : vector<1x32x1xf32> to vector<32x1xf32>
    %32 = vector.broadcast %29 : vector<32x1xf32> to vector<32x8xf32>
    %33 = arith.mulf %32, %27 : vector<32x8xf32>
    %34 = vector.broadcast %31 : vector<32x1xf32> to vector<32x8xf32>
    %35 = arith.addf %33, %34 : vector<32x8xf32>
    %36 = math.tanh %35 : vector<32x8xf32>
    %c0_22 = arith.constant 0 : index
    %c0_23 = arith.constant 0 : index
    %37 = vector.load %arg6[%c0_22, %c0_23] : memref<32x32xf32, #tpu.memory_space<vmem>>, vector<32x32xf32>
    %cst_24 = arith.constant dense<0.000000e+00> : vector<32x8xf32>
    %38 = tpu.matmul %37, %36, %cst_24 {dimension_numbers = #tpu.dot_dimension_numbers<[1], [0], [0], [1], [0, 0, 1, 1], [], []>} : vector<32x32xf32>, vector<32x8xf32>, vector<32x8xf32> -> vector<32x8xf32>
    %c0_25 = arith.constant 0 : index
    %c32 = arith.constant 32 : index
    %c0_26 = arith.constant 0 : index
    %39 = vector.load %arg3[%c0_25, %c32, %c0_26] : memref<1x68x1xf32, #tpu.memory_space<vmem>>, vector<1x32x1xf32>
    %40 = vector.shape_cast %39 : vector<1x32x1xf32> to vector<32x1xf32>
    %c0_27 = arith.constant 0 : index
    %c32_28 = arith.constant 32 : index
    %c0_29 = arith.constant 0 : index
    %41 = vector.load %arg4[%c0_27, %c32_28, %c0_29] : memref<1x68x1xf32, #tpu.memory_space<vmem>>, vector<1x32x1xf32>
    %42 = vector.shape_cast %41 : vector<1x32x1xf32> to vector<32x1xf32>
    %43 = vector.broadcast %40 : vector<32x1xf32> to vector<32x8xf32>
    %44 = arith.mulf %43, %38 : vector<32x8xf32>
    %45 = vector.broadcast %42 : vector<32x1xf32> to vector<32x8xf32>
    %46 = arith.addf %44, %45 : vector<32x8xf32>
    %47 = math.tanh %46 : vector<32x8xf32>
    %c0_30 = arith.constant 0 : index
    %c0_31 = arith.constant 0 : index
    %48 = vector.load %arg7[%c0_30, %c0_31] : memref<4x32xf32, #tpu.memory_space<vmem>>, vector<4x32xf32>
    %cst_32 = arith.constant dense<0.000000e+00> : vector<4x8xf32>
    %49 = tpu.matmul %48, %47, %cst_32 {dimension_numbers = #tpu.dot_dimension_numbers<[1], [0], [0], [1], [0, 0, 1, 1], [], []>} : vector<4x32xf32>, vector<32x8xf32>, vector<4x8xf32> -> vector<4x8xf32>
    %c0_33 = arith.constant 0 : index
    %c64 = arith.constant 64 : index
    %c0_34 = arith.constant 0 : index
    %50 = vector.load %arg3[%c0_33, %c64, %c0_34] : memref<1x68x1xf32, #tpu.memory_space<vmem>>, vector<1x4x1xf32>
    %51 = vector.shape_cast %50 : vector<1x4x1xf32> to vector<4x1xf32>
    %c0_35 = arith.constant 0 : index
    %c64_36 = arith.constant 64 : index
    %c0_37 = arith.constant 0 : index
    %52 = vector.load %arg4[%c0_35, %c64_36, %c0_37] : memref<1x68x1xf32, #tpu.memory_space<vmem>>, vector<1x4x1xf32>
    %53 = vector.shape_cast %52 : vector<1x4x1xf32> to vector<4x1xf32>
    %54 = vector.broadcast %51 : vector<4x1xf32> to vector<4x8xf32>
    %55 = arith.mulf %54, %49 : vector<4x8xf32>
    %56 = vector.broadcast %53 : vector<4x1xf32> to vector<4x8xf32>
    %57 = arith.addf %55, %56 : vector<4x8xf32>
    %c0_38 = arith.constant 0 : index
    %c0_39 = arith.constant 0 : index
    %c0_40 = arith.constant 0 : index
    %58 = vector.load %arg8[%c0_38, %c0_39, %c0_40] : memref<1x4x8xf32, #tpu.memory_space<vmem>>, vector<1x4x8xf32>
    %59 = vector.shape_cast %58 : vector<1x4x8xf32> to vector<4x8xf32>
    %60 = vector.shape_cast %57 : vector<4x8xf32> to vector<1x4x8xf32>
    tpu.vector_store %arg8[%c0_38, %c0_39, %c0_40], %60 {strides = array<i32>} : memref<1x4x8xf32, #tpu.memory_space<vmem>>, vector<1x4x8xf32>,
    return
  }
  func.func @transform_0(%arg0: i32, %arg1: i32) -> (i32, i32, i32) {
    %c0_i32 = arith.constant 0 : i32
    %c0_i32_0 = arith.constant 0 : i32
    return %arg0, %c0_i32, %arg1 : i32, i32, i32
  }
  func.func @transform_1(%arg0: i32, %arg1: i32) -> (i32, i32, i32) {
    %c0_i32 = arith.constant 0 : i32
    %c0_i32_0 = arith.constant 0 : i32
    %c0_i32_1 = arith.constant 0 : i32
    return %arg0, %c0_i32, %c0_i32_0 : i32, i32, i32
  }
  func.func @transform_2(%arg0: i32, %arg1: i32) -> (i32, i32, i32) {
    %c0_i32 = arith.constant 0 : i32
    %c0_i32_0 = arith.constant 0 : i32
    %c0_i32_1 = arith.constant 0 : i32
    return %arg0, %c0_i32, %c0_i32_0 : i32, i32, i32
  }
  func.func @transform_3(%arg0: i32, %arg1: i32) -> (i32, i32) {
    %c0_i32 = arith.constant 0 : i32
    %c0_i32_0 = arith.constant 0 : i32
    %c0_i32_1 = arith.constant 0 : i32
    return %c0_i32, %c0_i32_0 : i32, i32
  }
  func.func @transform_4(%arg0: i32, %arg1: i32) -> (i32, i32) {
    %c0_i32 = arith.constant 0 : i32
    %c0_i32_0 = arith.constant 0 : i32
    %c0_i32_1 = arith.constant 0 : i32
    return %c0_i32, %c0_i32_0 : i32, i32
  }
  func.func @transform_5(%arg0: i32, %arg1: i32) -> (i32, i32) {
    %c0_i32 = arith.constant 0 : i32
    %c0_i32_0 = arith.constant 0 : i32
    %c0_i32_1 = arith.constant 0 : i32
    return %c0_i32, %c0_i32_0 : i32, i32
  }
  func.func @transform_6(%arg0: i32, %arg1: i32) -> (i32, i32, i32) {
    %c0_i32 = arith.constant 0 : i32
    %c0_i32_0 = arith.constant 0 : i32
    return %arg0, %c0_i32, %arg1 : i32, i32, i32
  }
}

</mosaic_0001>

<bundles_post_ra>
// kernel: ode_func_forward.1
= control target key start
LH: loop header
LB: loop body
LE: loop exit
PB: predicated region body
PF: predicated region fallthrough
CT: control target
= control target key end

     0   :  { %11 = vsyncpa [#allocation3], 0  ;;  %s2174_s0 = inlined_call_operand.vmem [shape: f32[2,4,8], index: 0, kind: input, shape index: {}]   ;;  %s2175_s1 = inlined_call_operand.vmem [shape: f32[2,68,1], index: 1, kind: input, shape index: {}]   ;;  %s2176_s2 = inlined_call_operand.vmem [shape: f32[2,68,1], index: 2, kind: input, shape index: {}]   ;;  %s2177_s3 = inlined_call_operand.vmem [shape: f32[32,20], index: 3, kind: input, shape index: {}]   ;;  %s2178_s4 = inlined_call_operand.vmem [shape: f32[32,32], index: 4, kind: input, shape index: {}]   ;;  %s2179_s5 = inlined_call_operand.vmem [shape: f32[4,32], index: 5, kind: input, shape index: {}]   ;;  %s2180_s6 = inlined_call_operand.hbm [shape: f32[2,4,8], index: 6, kind: output, shape index: {}]  }
   0x1   :  { %13 = vsyncpa [#allocation3 + $0x1], 0  ;;  %s1773_s21 = smov 0   ;;  %s1775_s22 = smov 0  }
   0x2   :  { %s1777_s23 = smov 0   ;;  %s1779_s24 = smov 0  }
   0x3   :  { %s1781_s25 = smov 0   ;;  %s1783_s26 = smov 0  }
   0x4 LB: > { %s1504_s27 = sadd.s32 4294967295, %s1725_s26   ;;  %s1505_s28 = sadd.s32 4294967294, %s1725_s26   ;;  %s1725_s26 = sphi %s1783_s26, %s19_s26   ;;  %s1721_s25 = sphi %s1781_s25, %s2191_s25   ;;  %s1717_s24 = sphi %s1779_s24, %s2190_s24   ;;  %s1713_s23 = sphi %s1777_s23, %s2189_s23   ;;  %s1709_s22 = sphi %s1775_s22, %s2188_s22   ;;  %s1705_s21 = sphi %s1773_s21, %s2187_s21  }
   0x5   : > { %s31_s29 = sadd.s32 1, %s1721_s25  ;;  %s183_s30 = sadd.s32 1, %s1713_s23 }
   0x6   : > { %p33_p0 = scmp.ge.s32.totalorder %s31_s29, 2  ;;  %p193_p1 = scmp.ne.s32.totalorder %s1713_s23, %s1709_s22 }
   0x7   : > { %p194_p2 = scmp.eq.s32.totalorder %s1504_s27, 1  ;;  %p199_p3 = scmp.ne.s32.totalorder %s1709_s22, %s1705_s21 }
   0x8   : > { %s2193_s29 = smov (%p33_p0, %s31_s29), 0  ;;  %p200_p5 = scmp.eq.s32.totalorder %s1505_s28, 1 }
   0x9   : > { %p1813_p4 = por %p194_p2, %p193_p1  ;;  %s178_s8 = ssub.s32 %s1721_s25, %s2193_s29 }
   0xa   : > { %p1508_p6 = scmp.ge.s32.totalorder %s1725_s26, 1  ;;  %p181_p7 = scmp.eq.s32.totalorder %s178_s8, 0 }
   0xb   : > { %p1820_p8 = por %p200_p5, %p199_p3  ;;  %p253_p9 = scmp.lt.s32.totalorder %s1725_s26, 3 }
   0xc   : > { %s1826_s10 = scalar_select %p181_p7, %s1713_s23, %s183_s30  }
   0xd   : > { %p254_p10 = pnand %p1508_p6, %p253_p9 }
   0xe   : > { %s1727_s15 = smov (!%p254_p10), 124   ;;  %s1728_s16 = smov (!%p254_p10), 120  }
   0xf   : > { %257 = sbr.rel (%p254_p10) target bundleno = 645 (0x285), region = 44  ;;  %p295_p11 = scmp.lt.s32.totalorder (!%p254_p10), %s1717_s24, 1 }
  0x10   : > { %s1729_s12 = smov (!%p254_p10), 116   ;;  %s1731_s13 = smov (!%p254_p10), 112  }
  0x11   : > { %s1556_s20 = sshll.u32 (!%p254_p10), %s1717_s24, 2 }
  0x14   : > { %v1831_v0 = vld [vmem:[%s2177_s3 + $0x8] sm:$0xff]  ;;  %v1836_v1 = vld [vmem:[%s2177_s3] sm:$0xff]  ;;  %s1844_s17 = scalar_select %p295_p11, %s1717_s24, 1  ;;  %v1849_v2 = vld [vmem:[%s2177_s3 + $0x10] sm:$0xff]  ;;  %v1730_v15 = vmov 0  }
  0x15   : > { %478 = vrot.lane.b32.xlu0 %v1831_v0, %s1727_s15  ;;  %476 = vrot.lane.b32.xlu1 %v1836_v1, %s1727_s15  ;;  %v1854_v3 = vld [vmem:[%s2177_s3 + $0x18] sm:$0xff]  ;;  %v1732_v23 = vmov 683565275   ;;  %v1733_v25 = vmov 2475754826  }
  0x16   : > { %720 = vrot.lane.b32.xlu2 %v1836_v1, %s1728_s16  ;;  %s1510_s28 = sshll.u32 %s1844_s17, 2  ;;  %1628 = vset.pattern.permute.xlu1 %v1730_v15  ;;  %v1734_v27 = vmov 2131351028   ;;  %v1735_v29 = vmov 2102212464   ;;  %s1561_s14 = smul.u32 72, %s1844_s17 }
  0x17   : > { %s301_s11 = scalar_lea.vmem %s2174_s0, %s1510_s28  ;;  %1630 = vset.pattern.permute.xlu0 %v1730_v15  ;;  %1629 = vset.pattern.permute.xlu2 %v1730_v15  ;;  %v1736_v31 = vmov 920167782   ;;  %v1737_v40 = vmov 1326507024   ;;  %s1404_s28 = scalar_lea.hbm %s2180_s6, %s1556_s20 }
  0x18   : > { %v1860_v4 = vld [vmem:[%s301_s11] sm:$0xf]  ;;  %s2038_s18 = scalar_lea.vmem %s2175_s1, %s1561_s14  ;;  %s2079_s27 = scalar_lea.vmem %s2176_s2, %s1561_s14 }
  0x19   : > { %v317_v5 = vand.u32 2147483647, %v1860_v4  ;;  %v320_v6 = vand.u32 2139095040, %v1860_v4  ;;  %v1867_v7 = vmul.f32 2.0, %v1860_v4  ;;  %s1408_s11 = sshll.u32 %s1404_s28, 4  ;;  %s1409_s11 = int_to_ptr.hbm [resolvable:$true] %s1408_s11 }
  0x1b   : > { %v321_v8 = vshrl.u32 %v320_v6, 23  ;;  %v324_v9 = vand.u32 8388607, %v317_v5  ;;  %v776_v10 = vand.u32 2139095040, %v1867_v7  ;;  %v773_v58 = vand.u32 2147483647, %v1867_v7 }
  0x1d   : > { %480 = vrot.lane.b32.xlu0 %v1849_v2, %s1727_s15  ;;  %482 = vrot.lane.b32.xlu1 %v1854_v3, %s1727_s15  ;;  %v1513_v11 = vadd.s32 4294967169, %v321_v8  ;;  %v777_v12 = vshrl.u32 %v776_v10, 23  ;;  %v325_v13 = vor.u32 8388608, %v324_v9 }
  0x1e   : > { %928 = vrot.lane.b32.xlu2 %v1836_v1, %s1729_s12 }
  0x1f   : > { %v327_v14 = vadd.s32 1, %v1513_v11  ;;  %v1534_v16 = vadd.s32 4294967169, %v777_v12  ;;  %v1883_v19 = vshll.u32 %v325_v13, 8 }
  0x21   : > { %vm328_vm0 = vcmp.gt.s32.totalorder %v327_v14, 0  ;;  %v783_v17 = vadd.s32 1, %v1534_v16  ;;  %v366_v33 = vand.u32 65535, %v1883_v19  ;;  %v367_v55 = vshrl.u32 %v1883_v19, 16 }
  0x22   : > { %v329_v18 = vsel %vm328_vm0, %v327_v14, 0 }
  0x23   : > { %v331_v20 = vand.u32 31, %v329_v18  ;;  %vm784_vm1 = vcmp.gt.s32.totalorder %v783_v17, 0  ;;  %v330_v21 = vshrl.u32 %v329_v18, 5 }
  0x24   : > { %v785_v34 = vsel %vm784_vm1, %v783_v17, 0 }
  0x25   : > { %722 = vrot.lane.b32.xlu0 %v1831_v0, %s1728_s16  ;;  %930 = vrot.lane.b32.xlu1 %v1831_v0, %s1729_s12  ;;  %v332_v22 = vsub.s32 32, %v331_v20  ;;  %v334_v24 = vshll.u32 %v1732_v23, %v331_v20  ;;  %v337_v26 = vshll.u32 %v1733_v25, %v331_v20  ;;  %v340_v28 = vshll.u32 %v1734_v27, %v331_v20 }
  0x26   : > { %1134 = vrot.lane.b32.xlu2 %v1836_v1, %s1731_s13  ;;  %v343_v30 = vshll.u32 %v1735_v29, %v331_v20  ;;  %v346_v32 = vshll.u32 %v1736_v31, %v331_v20  ;;  %vm349_vm2 = vcmp.lt.s32.totalorder %v330_v21, 1  ;;  %vm350_vm3 = vcmp.lt.s32.totalorder %v330_v21, 2 }
  0x27   : > { %v333_v35 = vshrl.u32 %v1732_v23, %v332_v22  ;;  %v335_v36 = vshrl.u32 %v1733_v25, %v332_v22  ;;  %v338_v37 = vshrl.u32 %v1734_v27, %v332_v22  ;;  %v341_v38 = vshrl.u32 %v1735_v29, %v332_v22 }
  0x28   : > { %v344_v39 = vshrl.u32 %v1736_v31, %v332_v22  ;;  %v347_v41 = vshrl.u32 %v1737_v40, %v332_v22  ;;  %vm352_vm4 = vcmp.lt.s32.totalorder %v330_v21, 4  ;;  %vm351_vm5 = vcmp.lt.s32.totalorder %v330_v21, 3 }
  0x29   : > { %v336_v42 = vor.u32 %v335_v36, %v334_v24  ;;  %v339_v43 = vor.u32 %v338_v37, %v337_v26  ;;  %v342_v44 = vor.u32 %v341_v38, %v340_v28  ;;  %v1901_v47 = vand.u32 31, %v785_v34 }
  0x2a   : > { %v345_v45 = vor.u32 %v344_v39, %v343_v30  ;;  %v348_v46 = vor.u32 %v347_v41, %v346_v32  ;;  %v1916_v63 = vshrl.u32 %v785_v34, 5  ;;  %v780_v20 = vand.u32 8388607, %v773_v58 }
  0x2b   : > { %v353_v48 = vsel %vm349_vm2, %v333_v35, %v336_v42  ;;  %v354_v49 = vsel %vm352_vm4, %v342_v44, 2102212464  ;;  %v357_v50 = vsel %vm349_vm2, %v336_v42, %v339_v43  ;;  %v361_v51 = vsel %vm349_vm2, %v339_v43, %v342_v44 }
  0x2c   : > { %v355_v52 = vsel %vm351_vm5, %v339_v43, %v354_v49  ;;  %v358_v53 = vsel %vm352_vm4, %v345_v45, 920167782  ;;  %v362_v54 = vsel %vm352_vm4, %v348_v46, 1326507024  ;;  %v1909_v59 = vsub.s32 32, %v1901_v47 }
  0x2d   : > { %724 = vrot.lane.b32.xlu0 %v1849_v2, %s1728_s16  ;;  %932 = vrot.lane.b32.xlu1 %v1849_v2, %s1729_s12  ;;  %v359_v56 = vsel %vm351_vm5, %v342_v44, %v358_v53  ;;  %v363_v57 = vsel %vm351_vm5, %v345_v45, %v362_v54  ;;  %v1912_v60 = vsel %vm350_vm3, %v353_v48, %v355_v52  ;;  %vm805_vm6 = vcmp.lt.s32.totalorder %v1916_v63, 1 }
  0x2e   : > { %1136 = vrot.lane.b32.xlu2 %v1831_v0, %s1731_s13  ;;  %v360_v61 = vsel %vm350_vm3, %v357_v50, %v359_v56  ;;  %v364_v62 = vsel %vm350_vm3, %v361_v51, %v363_v57  ;;  %v790_v11 = vshll.u32 %v1732_v23, %v1901_v47  ;;  %v791_v12 = vshrl.u32 %v1733_v25, %v1909_v59 }
  0x2f   : > { %v368_v6 = vand.u32 65535, %v364_v62  ;;  %v369_v8 = vshrl.u32 %v364_v62, 16  ;;  %v390_v9 = vand.u32 65535, %v360_v61  ;;  %v391_v10 = vshrl.u32 %v360_v61, 16 }
  0x30   : > { %v793_v13 = vshll.u32 %v1733_v25, %v1901_v47  ;;  %v794_v14 = vshrl.u32 %v1734_v27, %v1909_v59  ;;  %v796_v45 = vshll.u32 %v1734_v27, %v1901_v47  ;;  %v797_v52 = vshrl.u32 %v1735_v29, %v1909_v59 }
  0x31   : > { %v370_v16 = vmul.u32 %v368_v6, %v366_v33  ;;  %v371_v17 = vmul.u32 %v369_v8, %v366_v33  ;;  %v372_v18 = vmul.u32 %v368_v6, %v367_v55  ;;  %v392_v21 = vmul.u32 %v390_v9, %v366_v33 }
  0x32   : > { %v393_v22 = vmul.u32 %v391_v10, %v366_v33  ;;  %v394_v24 = vmul.u32 %v390_v9, %v367_v55  ;;  %v373_v25 = vmul.u32 %v369_v8, %v367_v55  ;;  %v395_v34 = vmul.u32 %v391_v10, %v367_v55 }
  0x33   : > { %v374_v26 = vshll.u32 %v371_v17, 16  ;;  %v375_v28 = vshrl.u32 %v371_v17, 16  ;;  %v376_v30 = vshll.u32 %v372_v18, 16  ;;  %v377_v32 = vshrl.u32 %v372_v18, 16 }
  0x34   : > { %v396_v35 = vshll.u32 %v393_v22, 16  ;;  %v398_v36 = vshll.u32 %v394_v24, 16  ;;  %v397_v38 = vshrl.u32 %v393_v22, 16  ;;  %v399_v39 = vshrl.u32 %v394_v24, 16 }
  0x35   : > { %726 = vrot.lane.b32.xlu0 %v1854_v3, %s1728_s16  ;;  %934 = vrot.lane.b32.xlu1 %v1854_v3, %s1729_s12  ;;  %vm378_vm7 = vc.u32 %v370_v16, %v374_v26  ;;  %v380_v37 = vadd.s32 %v374_v26, %v370_v16  ;;  %v1934_v33 = vor.u32 %v791_v12, %v790_v11  ;;  %vm807_vm11 = vcmp.lt.s32.totalorder %v1916_v63, 3  ;;  %s1667_s16 = scalar_lea.hbm %s2180_s6, 8 }
  0x36   : > { %1138 = vrot.lane.b32.xlu2 %v1849_v2, %s1731_s13  ;;  %v379_v41 = vsel %vm378_vm7, 1, %v1730_v15  ;;  %vm400_vm8 = vc.u32 %v392_v21, %v396_v35  ;;  %v402_v42 = vadd.s32 %v396_v35, %v392_v21  ;;  %v1940_v49 = vor.u32 %v794_v14, %v793_v13 }
  0x37   : > { %v381_v43 = vadd.s32 %v379_v41, %v373_v25  ;;  %vm382_vm9 = vc.u32 %v380_v37, %v376_v30  ;;  %v401_v44 = vsel %vm400_vm8, 1, %v1730_v15  ;;  %v799_v53 = vshll.u32 %v1735_v29, %v1901_v47 }
  0x38   : > { %v383_v46 = vsel %vm382_vm9, 1, %v1730_v15  ;;  %v403_v48 = vadd.s32 %v401_v44, %v395_v34  ;;  %vm404_vm10 = vc.u32 %v402_v42, %v398_v36  ;;  %v800_v27 = vshrl.u32 %v1736_v31, %v1909_v59 }
  0x39   : > { %v385_v50 = vadd.s32 %v383_v46, %v381_v43  ;;  %v405_v51 = vsel %vm404_vm10, 1, %v1730_v15  ;;  %v802_v55 = vshll.u32 %v1736_v31, %v1901_v47  ;;  %v803_v56 = vshrl.u32 %v1737_v40, %v1909_v59 }
  0x3a   : > { %v407_v54 = vadd.s32 %v405_v51, %v403_v48  ;;  %v1955_v61 = vadd.s32 %v402_v42, %v398_v36  ;;  %v798_v62 = vor.u32 %v797_v52, %v796_v45  ;;  %v801_v8 = vor.u32 %v800_v27, %v799_v53 }
  0x3b   : > { %v386_v57 = vadd.s32 %v385_v50, %v375_v28  ;;  %v804_v9 = vor.u32 %v803_v56, %v802_v55  ;;  %vm808_vm12 = vcmp.lt.s32.totalorder %v1916_v63, 4  ;;  %v781_v10 = vor.u32 8388608, %v780_v20 }
  0x3c   : > { %v408_v6 = vadd.s32 %v407_v54, %v397_v38  ;;  %vm806_vm13 = vcmp.lt.s32.totalorder %v1916_v63, 2  ;;  %v813_v31 = vsel %vm805_vm6, %v1934_v33, %v1940_v49  ;;  %v814_v47 = vsel %vm808_vm12, %v801_v8, 920167782 }
  0x3d   : > { %1140 = vrot.lane.b32.xlu0 %v1854_v3, %s1731_s13  ;;  %v1959_v29 = vadd.s32 %v386_v57, %v377_v32  ;;  %v818_v11 = vsel %vm808_vm12, %v804_v9, 1326507024  ;;  %v410_v12 = vmul.u32 %v1883_v19, %v1912_v60  ;;  %v815_v13 = vsel %vm807_vm11, %v798_v62, %v814_v47  ;;  %s1661_s13 = sshra.s32 %s1409_s11, 4  ;;  %s1662_s13 = int_to_ptr.hbm [resolvable:$true] %s1661_s13 }
  0x3e   : > { %v409_v40 = vadd.s32 %v408_v6, %v399_v39  ;;  %v817_v14 = vsel %vm805_vm6, %v1940_v49, %v798_v62  ;;  %v816_v17 = vsel %vm806_vm13, %v813_v31, %v815_v13  ;;  %v819_v18 = vsel %vm807_vm11, %v801_v8, %v818_v11  ;;  %s1663_s24 = scalar_lea.hbm %s1662_s13, 4  ;;  %p1668_p1 = scmp.lt.s32.totalorder %s1662_s13, %s2180_s6 }
  0x3f   : > { %vm412_vm14 = vc.u32 %v1959_v29, %v1955_v61  ;;  %v1983_v20 = vshll.u32 %v781_v10, 8  ;;  %v820_v60 = vsel %vm806_vm13, %v817_v14, %v819_v18  ;;  %v846_v21 = vand.u32 65535, %v816_v17  ;;  %p1664_p12 = scmp.ne.s32.totalorder %s1662_s13, %s1663_s24  ;;  %p1669_p2 = scmp.lt.s32.totalorder %s1667_s16, %s1663_s24 }
  0x40   : > { %v413_v16 = vadd.s32 1, %v409_v40  ;;  %v847_v22 = vshrl.u32 %v816_v17, 16  ;;  %v824_v28 = vand.u32 65535, %v820_v60  ;;  %v825_v30 = vshrl.u32 %v820_v60, 16 }
  0x41   : > { %v822_v25 = vand.u32 65535, %v1983_v20  ;;  %v823_v26 = vshrl.u32 %v1983_v20, 16  ;;  %v789_v34 = vshrl.u32 %v1732_v23, %v1909_v59  ;;  %v810_v23 = vsel %vm808_vm12, %v798_v62, 2102212464  ;;  %p1665_p13 = pnand %p1664_p12, %p1813_p4  ;;  %p1670_p3 = por %p1669_p2, %p1668_p1 }
  0x42   : > { %v414_v19 = vsel %vm412_vm14, %v413_v16, %v409_v40  ;;  %v811_v62 = vsel %vm807_vm11, %v1940_v49, %v810_v23  ;;  %v411_v49 = vadd.s32 %v1955_v61, %v1959_v29  ;;  %vm319_vm7 = vcmp.lt.s32.totalorder %v1860_v4, 0 }
  0x43   : > { %v415_v24 = vadd.s32 %v414_v19, %v410_v12  ;;  %v826_v35 = vmul.u32 %v824_v28, %v822_v25  ;;  %v828_v36 = vmul.u32 %v824_v28, %v823_v26  ;;  %v827_v37 = vmul.u32 %v825_v30, %v822_v25  ;;  %p1666_p0 = pneg %p1665_p13 }
  0x44   : > { %v848_v38 = vmul.u32 %v846_v21, %v822_v25  ;;  %v849_v39 = vmul.u32 %v847_v22, %v822_v25  ;;  %v850_v41 = vmul.u32 %v846_v21, %v823_v26  ;;  %v829_v43 = vmul.u32 %v825_v30, %v823_v26 }
  0x45   : > { %v416_v32 = vadd.s32 536870912, %v415_v24  ;;  %v830_v44 = vshll.u32 %v827_v37, 16  ;;  %v832_v45 = vshll.u32 %v828_v36, 16  ;;  %v851_v46 = vmul.u32 %v847_v22, %v823_v26  ;;  %p1671_p5 = pnand %p1670_p3, %p1666_p0 }
  0x46   : > { %v852_v48 = vshll.u32 %v849_v39, 16  ;;  %v809_v51 = vsel %vm805_vm6, %v789_v34, %v1934_v33  ;;  %v854_v59 = vshll.u32 %v850_v41, 16  ;;  %v831_v27 = vshrl.u32 %v827_v37, 16 }
  0x47   : > { %v1991_v42 = vshrl.u32 %v416_v32, 30  ;;  %vm834_vm15 = vc.u32 %v826_v35, %v830_v44  ;;  %v836_v52 = vadd.s32 %v830_v44, %v826_v35  ;;  %v853_v6 = vshrl.u32 %v849_v39, 16 }
  0x48   : > { %vm856_vm0 = vc.u32 %v848_v38, %v852_v48  ;;  %v858_v53 = vadd.s32 %v852_v48, %v848_v38  ;;  %v835_v55 = vsel %vm834_vm15, 1, %v1730_v15  ;;  %v833_v10 = vshrl.u32 %v828_v36, 16 }
  0x49   : > { %v418_v50 = vshll.u32 %v1991_v42, 30  ;;  %v857_v56 = vsel %vm856_vm0, 1, %v1730_v15  ;;  %v837_v57 = vadd.s32 %v835_v55, %v829_v43  ;;  %vm838_vm1 = vc.u32 %v836_v52, %v832_v45 }
  0x4a   : > { %v859_v8 = vadd.s32 %v857_v56, %v851_v46  ;;  %v839_v9 = vsel %vm838_vm1, 1, %v1730_v15  ;;  %vm860_vm3 = vc.u32 %v858_v53, %v854_v59  ;;  %v855_v11 = vshrl.u32 %v850_v41, 16 }
  0x4b   : > { %v419_v54 = vsub.s32 %v415_v24, %v418_v50  ;;  %v841_v31 = vadd.s32 %v839_v9, %v837_v57  ;;  %v861_v40 = vsel %vm860_vm3, 1, %v1730_v15  ;;  %v862_v16 = vadd.s32 %v858_v53, %v854_v59 }
  0x4c   : > { %v863_v12 = vadd.s32 %v861_v40, %v859_v8  ;;  %v812_v17 = vsel %vm806_vm13, %v809_v51, %v811_v62  ;;  %vm2016_vm6 = vcmp.le.f32.partialorder %v317_v5, 0.7853982  ;;  %v441_v45 = vsub.s32 4, %v1991_v42 }
  0x4d   : > { %vm420_vm2 = vcmp.lt.s32.totalorder %v419_v54, 0  ;;  %v421_v33 = vsub.s32 0, %v419_v54  ;;  %v842_v14 = vadd.s32 %v841_v31, %v831_v27  ;;  %v866_v22 = vmul.u32 %v1983_v20, %v812_v17  ;;  %v1189_v31 = vld [vmem:[%s2038_s18 + $0x18] sm:$0xff] }
  0x4e   : > { %v864_v18 = vadd.s32 %v863_v12, %v853_v6  ;;  %vm493_vm8 = vcmask 1043456   ;;  %vm484_vm10 = vcmask 31744   ;;  %v442_v51 = vsel %vm319_vm7, %v441_v45, %v1991_v42  ;;  %1211 = vperm.xlu1 %1628, %v1189_v31   ;;  %v1186_v45 = vld [vmem:[%s2038_s18] sm:$0xff] }
  0x4f   : > { %v422_v47 = vsel %vm420_vm2, %v421_v33, %v419_v54  ;;  %v843_v60 = vadd.s32 %v842_v14, %v833_v10  ;;  %1560 = vmatpush.msk.msra.mxu1 %vm493_vm8, %v1860_v4  ;;  %vm775_vm2 = vcmp.lt.s32.totalorder %v1867_v7, 0  ;;  %vm460_vm3 = vweird.f32 %v1860_v4 }
  0x50   : > { %v423_v13 = vclz %v422_v47  ;;  %v865_v21 = vadd.s32 %v864_v18, %v855_v11  ;;  %1523 = vmatmul.msk.f32.vlgmr.msra.gmra.mxu1 %vm484_vm10, %v1831_v0 }
  0x51   : > { %vm868_vm5 = vc.u32 %v843_v60, %v862_v16  ;;  %v867_v0 = vadd.s32 %v862_v16, %v843_v60 }
  0x52   : > { %v1514_v19 = vadd.s32 4294967294, %v423_v13  ;;  %v869_v24 = vadd.s32 1, %v865_v21 }
  0x54   : > { %vm1515_vm4 = vcmp.lt.s32.totalorder %v1514_v19, 0  ;;  %v870_v30 = vsel %vm868_vm5, %v869_v24, %v865_v21 }
  0x55   : > { %v426_v15 = vsel %vm1515_vm4, 0, %v1514_v19  ;;  %v871_v34 = vadd.s32 %v870_v30, %v866_v22  ;;  %vm2051_vm4 = vcmp.le.f32.partialorder %v773_v58, 0.7853982 }
  0x56   : > { %v427_v25 = vsub.s32 32, %v426_v15  ;;  %v428_v26 = vshll.u32 %v419_v54, %v426_v15  ;;  %v431_v28 = vsub.s32 4294967266, %v426_v15  ;;  %v444_v54 = vsel %vm2016_vm6, 0, %v442_v51 }
  0x57   : > { %v872_v37 = vadd.s32 536870912, %v871_v34  ;;  %v461_v6 = vadd.s32 3, %v444_v54  ;;  %v710_v14 = vand.u32 3, %v444_v54 }
  0x58   : > { %v429_v32 = vshrl.u32 %v411_v49, %v427_v25  ;;  %v432_v63 = vadd.s32 127, %v431_v28  ;;  %1524 = vmatmul.msk.f32.gmra.mxu1 %vm484_vm10, %v1849_v2  ;;  %v1187_v25 = vld [vmem:[%s2038_s18 + $0x8] sm:$0xff] }
  0x59   : > { %v2011_v41 = vshrl.u32 %v872_v37, 30  ;;  %v462_v13 = vand.u32 3, %v461_v6  ;;  %vm715_vm13 = vcmp.eq.s32.totalorder %v710_v14, 2  ;;  %vm711_vm0 = vcmp.lt.s32.totalorder %v710_v14, 2  ;;  %1201 = vperm.xlu1 %1628, %v1187_v25  }
  0x5a   : > { %v430_v35 = vor.u32 %v429_v32, %v428_v26  ;;  %v433_v36 = vshll.u32 %v432_v63, 23  ;;  %vm712_vm1 = vcmp.eq.s32.totalorder %v710_v14, 0 }
  0x5b   : > { %v874_v29 = vshll.u32 %v2011_v41, 30  ;;  %vm467_vm12 = vcmp.eq.s32.totalorder %v462_v13, 2  ;;  %vm463_vm14 = vcmp.lt.s32.totalorder %v462_v13, 2  ;;  %vm464_vm15 = vcmp.eq.s32.totalorder %v462_v13, 0  ;;  %v1190_v13 = vld [vmem:[%s2079_s27] sm:$0xff] }
  0x5c   : > { %v434_v38 = vor.u32 4788187, %v433_v36  ;;  %v437_v39 = vcvt.s32.f32 %v430_v35  ;;  %v897_v63 = vsub.s32 4, %v2011_v41 }
  0x5d   : > { %v875_v43 = vsub.s32 %v871_v34, %v874_v29 }
  0x5e   : > { %v435_v61 = vand.u32 2147483647, %v434_v38  ;;  %v898_v58 = vsel %vm775_vm2, %v897_v63, %v2011_v41  ;;  %v1294_v63 = vld [vmem:[%s2038_s18 + $0x30] sm:$0xff] }
  0x5f   : > { %vm876_vm9 = vcmp.lt.s32.totalorder %v875_v43, 0  ;;  %v877_v48 = vsub.s32 0, %v875_v43  ;;  %v900_v41 = vsel %vm2051_vm4, 0, %v898_v58 }
  0x60   : > { %v438_v20 = vmul.f32 %v437_v39, %v435_v61  ;;  %1525 = vmatmul.msk.f32.gmra.mxu1 %vm484_vm10, %v1854_v3  ;;  %v917_v51 = vadd.s32 3, %v900_v41 }
  0x61   : > { %v878_v5 = vsel %vm876_vm9, %v877_v48, %v875_v43  ;;  %1196 = vperm.xlu1 %1628, %v1186_v45  }
  0x62   : > { %v439_v46 = vxor.u32 2147483648, %v438_v20  ;;  %v879_v59 = vclz %v878_v5 }
  0x64   : > { %v440_v50 = vsel %vm319_vm7, %v439_v46, %v438_v20  ;;  %v1535_v53 = vadd.s32 4294967294, %v879_v59 }
  0x65   : > { %v443_v23 = vsel %vm2016_vm6, %v1860_v4, %v440_v50 }
  0x66   : > { %v445_v52 = vmul.f32 %v443_v23, %v443_v23  ;;  %vm1536_vm11 = vcmp.lt.s32.totalorder %v1535_v53, 0 }
  0x67   : > { %v882_v57 = vsel %vm1536_vm11, 0, %v1535_v53 }
  0x68   : > { %v446_v27 = vmul.f32 -0.001358992, %v445_v52  ;;  %v453_v55 = vmul.f32 -0.00019511016, %v445_v52  ;;  %v883_v8 = vsub.s32 32, %v882_v57  ;;  %v884_v33 = vshll.u32 %v875_v43, %v882_v57 }
  0x69   : > { %v887_v9 = vsub.s32 4294967266, %v882_v57 }
  0x6a   : > { %v447_v42 = vadd.f32 0.041655596, %v446_v27  ;;  %v454_v56 = vadd.f32 0.008332121, %v453_v55  ;;  %v885_v40 = vshrl.u32 %v867_v0, %v883_v8  ;;  %v918_v55 = vand.u32 3, %v917_v51 }
  0x6b   : > { %v888_v47 = vadd.s32 127, %v887_v9  ;;  %v1124_v0 = vand.u32 3, %v900_v41 }
  0x6c   : > { %v448_v62 = vmul.f32 %v447_v42, %v445_v52  ;;  %v455_v10 = vmul.f32 %v454_v56, %v445_v52  ;;  %v886_v16 = vor.u32 %v885_v40, %v884_v33  ;;  %v1295_v42 = vld [vmem:[%s2038_s18 + $0x38] sm:$0xff]  ;;  %vm923_vm5 = vcmp.eq.s32.totalorder %v918_v55, 2 }
  0x6d   : > { %v889_v17 = vshll.u32 %v888_v47, 23  ;;  %v1193_v56 = vld [vmem:[%s2079_s27 + $0x18] sm:$0xff]  ;;  %1317 = vperm.xlu1 %1628, %v1295_v42   ;;  %vm1129_vm6 = vcmp.eq.s32.totalorder %v1124_v0, 2  ;;  %vm919_vm7 = vcmp.lt.s32.totalorder %v918_v55, 2  ;;  %vm920_vm9 = vcmp.eq.s32.totalorder %v918_v55, 0 }
  0x6e   : > { %v449_v11 = vadd.f32 -0.4999988, %v448_v62  ;;  %v456_v12 = vadd.f32 -0.16666654, %v455_v10  ;;  %v893_v21 = vcvt.s32.f32 %v886_v16  ;;  %1235 = vperm.xlu0 %1630, %v1193_v56   ;;  %vm1126_vm11 = vcmp.eq.s32.totalorder %v1124_v0, 0 }
  0x6f   : > { %v890_v60 = vor.u32 4788187, %v889_v17 }
  0x70   : > { %v450_v18 = vmul.f32 %v449_v11, %v445_v52  ;;  %v457_v19 = vmul.f32 %v456_v12, %v445_v52  ;;  %v721_v29 = vpop.permute.xlu2 %720  ;;  %v1188_v11 = vld [vmem:[%s2038_s18 + $0x10] sm:$0xff]  ;;  %v1293_v12 = vld [vmem:[%s2038_s18 + $0x28] sm:$0xff] }
  0x71   : > { %v891_v15 = vand.u32 2147483647, %v890_v60  ;;  %1206 = vperm.xlu2 %1629, %v1188_v11  }
  0x72   : > { %v451_v49 = vadd.f32 1.0, %v450_v18  ;;  %v458_v22 = vadd.f32 1.0, %v457_v19 }
  0x73   : > { %v894_v26 = vmul.f32 %v893_v21, %v891_v15  ;;  %v1299_v15 = vld [vmem:[%s2079_s27 + $0x38] sm:$0xff] }
  0x74   : > { %v459_v2 = vmul.f32 %v458_v22, %v443_v23  ;;  %v468_v24 = vxor.u32 2147483648, %v451_v49  ;;  %v1297_v22 = vld [vmem:[%s2079_s27 + $0x28] sm:$0xff] }
  0x75   : > { %v895_v3 = vxor.u32 2147483648, %v894_v26  ;;  %1307 = vperm.xlu1 %1628, %v1293_v12  }
  0x76   : > { %v465_v28 = vxor.u32 2147483648, %v459_v2  ;;  %v469_v30 = vsel %vm467_vm12, %v468_v24, %v459_v2  ;;  %v717_v32 = vsel %vm715_vm13, %v468_v24, %v459_v2  ;;  %vm1125_vm12 = vcmp.lt.s32.totalorder %v1124_v0, 2  ;;  %1220 = vperm.xlu0 %1630, %v1190_v13   ;;  %v1191_v24 = vld [vmem:[%s2079_s27 + $0x8] sm:$0xff] }
  0x77   : > { %v896_v39 = vsel %vm775_vm2, %v895_v3, %v894_v26  ;;  %vm916_vm13 = vweird.f32 %v1867_v7  ;;  %v1377_v26 = vld [vmem:[%s2079_s27 + $0x40] sm:$0xf] }
  0x78   : > { %v466_v35 = vsel %vm464_vm15, %v451_v49, %v465_v28  ;;  %v714_v36 = vsel %vm712_vm1, %v451_v49, %v465_v28  ;;  %v899_v43 = vsel %vm2051_vm4, %v1867_v7, %v896_v39  ;;  %v929_v27 = vpop.permute.xlu2 %928  ;;  %v1192_v49 = vld [vmem:[%s2079_s27 + $0x10] sm:$0xff]  ;;  %v1292_v28 = vld [vmem:[%s2038_s18 + $0x20] sm:$0xff] }
  0x79   : > { %v470_v37 = vsel %vm463_vm14, %v466_v35, %v469_v30  ;;  %v718_v38 = vsel %vm711_vm0, %v714_v36, %v717_v32  ;;  %v901_v44 = vmul.f32 %v899_v43, %v899_v43  ;;  %1230 = vperm.xlu2 %1629, %v1192_v49   ;;  %v1376_v3 = vld [vmem:[%s2038_s18 + $0x40] sm:$0xf]  ;;  %v1298_v36 = vld [vmem:[%s2079_s27 + $0x30] sm:$0xff]  ;;  %s292_s18 = sand.u32 1, %s1709_s22  }
  0x7a   : > { %v471_v61 = vsel %vm460_vm3, nan, %v470_v37  ;;  %v719_v20 = vsel %vm460_vm3, nan, %v718_v38  ;;  %v1296_v39 = vld [vmem:[%s2079_s27 + $0x20] sm:$0xff]  ;;  %s1509_s19 = sshll.u32 %s292_s18, 2  ;;  %s1393_s12 = scalar_lea.sflag [#allocation3], %s292_s18 }
  0x7b   : > { %1516 = vmatpush.msk.msra.mxu0 %vm493_vm8, %v471_v61  ;;  %1559 = vmatpush.msk.msra.mxu3 %vm493_vm8, %v471_v61  ;;  %v902_v46 = vmul.f32 -0.001358992, %v901_v44  ;;  %v909_v48 = vmul.f32 -0.00019511016, %v901_v44  ;;  %s294_s30 = scalar_lea.vmem [#allocation2], %s1509_s19 }
  0x7c   : > { %1529 = vmatpush.msk.msra.mxu2 %vm493_vm8, %v719_v20  ;;  %s1406_s8 = sshll.u32 %s294_s30, 4  ;;  %s1407_s8 = int_to_ptr.vmem [resolvable:$true] %s1406_s8 }
  0x7d   : > { %1521 = vmatpush.msk.msrb.mxu0 %vm493_vm8, %v1860_v4  ;;  %1530 = vmatmul.msk.f32.vlgmr.msra.gmra.mxu2 %vm484_vm10, %v721_v29  ;;  %v903_v50 = vadd.f32 0.041655596, %v902_v46  ;;  %v910_v5 = vadd.f32 0.008332121, %v909_v48 }
  0x7e   : > { %1331 = vperm.xlu1 %1628, %v1297_v22   ;;  %1341 = vperm.xlu0 %1630, %v1299_v15  }
  0x7f   : > { %v904_v23 = vmul.f32 %v903_v50, %v901_v44  ;;  %v911_v59 = vmul.f32 %v910_v5, %v901_v44 }
  0x80   : > { %v1135_v19 = vpop.permute.xlu2 %1134 }
  0x81   : > { %v905_v53 = vadd.f32 -0.4999988, %v904_v23  ;;  %v912_v54 = vadd.f32 -0.16666654, %v911_v59  ;;  %1225 = vperm.xlu2 %1629, %v1191_v24  }
  0x83   : > { %v906_v57 = vmul.f32 %v905_v53, %v901_v44  ;;  %v913_v6 = vmul.f32 %v912_v54, %v901_v44 }
  0x85   : > { %v907_v8 = vadd.f32 1.0, %v906_v57  ;;  %v914_v33 = vadd.f32 1.0, %v913_v6 }
  0x86   : > { %1386 = vperm.xlu1 %1628, %v1377_v26   ;;  %1302 = vperm.xlu0 %1630, %v1292_v28  }
  0x87   : > { %v479_v4 = vpop.permute.xlu0 %478  ;;  %v477_v52 = vpop.permute.xlu1 %476  ;;  %v915_v9 = vmul.f32 %v914_v33, %v899_v43  ;;  %v924_v62 = vxor.u32 2147483648, %v907_v8 }
  0x88   : > { %1517 = vmatmul.msk.f32.vlgmr.msra.gmra.mxu0 %vm484_vm10, %v477_v52  ;;  %1518 = vmatmul.msk.f32.vlgmr.msra.gmra.mxu3 %vm484_vm10, %v479_v4  ;;  %v1137_v2 = vpop.permute.xlu2 %1136 }
  0x89   : > { %v921_v31 = vxor.u32 2147483648, %v915_v9  ;;  %v925_v40 = vsel %vm923_vm5, %v924_v62, %v915_v9  ;;  %v1131_v47 = vsel %vm1129_vm6, %v924_v62, %v915_v9  ;;  %1312 = vperm.xlu2 %1629, %v1294_v63  }
  0x8b   : > { %v922_v14 = vsel %vm920_vm9, %v907_v8, %v921_v31  ;;  %v1128_v16 = vsel %vm1126_vm11, %v907_v8, %v921_v31 }
  0x8c   : > { %v926_v17 = vsel %vm919_vm7, %v922_v14, %v925_v40  ;;  %v1132_v18 = vsel %vm1125_vm12, %v1128_v16, %v1131_v47 }
  0x8d   : > { %v927_v60 = vsel %vm916_vm13, nan, %v926_v17 }
  0x8e   : > { %1537 = vmatpush.msk.msrb.mxu3 %vm493_vm8, %v927_v60  ;;  %1380 = vperm.xlu0 %1630, %v1376_v3   ;;  %v1248_v3 = vld [vmem:[%s2178_s4 + $0x10] sm:$0xff] }
  0x8f   : > { %v481_v10 = vpop.permute.xlu0 %480  ;;  %v483_v7 = vpop.permute.xlu1 %482 }
  0x90   : > { %1519 = vmatmul.msk.f32.gmra.mxu3 %vm484_vm10, %v481_v10  ;;  %1522 = vmatmul.msk.f32.vlgmr.msrb.gmra.mxu0 %vm484_vm10, %v1836_v1  ;;  %v1133_v1 = vsel %vm916_vm13, nan, %v1132_v18  ;;  %v1139_v32 = vpop.permute.xlu2 %1138 }
  0x91   : > { %1545 = vmatpush.msk.msra.mxu0 %vm493_vm8, %v1133_v1  ;;  %1336 = vperm.xlu2 %1629, %v1298_v36   ;;  %vm1250_vm8 = vcmask 261120  }
  0x97   : > { %v723_v21 = vpop.permute.xlu0 %722  ;;  %v931_v30 = vpop.permute.xlu1 %930 }
  0x98   : > { %1520 = vmatmul.msk.f32.gmra.mxu3 %vm484_vm10, %v483_v7  ;;  %1531 = vmatmul.msk.f32.gmra.mxu2 %vm484_vm10, %v723_v21 }
  0x99   : > { %1546 = vmatmul.msk.f32.vlgmr.msra.gmra.mxu0 %vm484_vm10, %v1135_v19  ;;  %1326 = vperm.xlu2 %1629, %v1296_v39  }
  0x9f   : > { %v725_v25 = vpop.permute.xlu0 %724  ;;  %v933_v35 = vpop.permute.xlu1 %932 }
  0xa0   : > { %1532 = vmatmul.msk.f32.gmra.mxu2 %vm484_vm10, %v725_v25  ;;  %1538 = vmatmul.msk.f32.vlgmr.msrb.gmra.mxu3 %vm484_vm10, %v929_v27 }
  0xa1   : > { %1547 = vmatmul.msk.f32.gmra.mxu0 %vm484_vm10, %v1137_v2 }
  0xa7   : > { %v727_v34 = vpop.permute.xlu0 %726  ;;  %v935_v38 = vpop.permute.xlu1 %934 }
  0xa8   : > { %1533 = vmatmul.msk.f32.gmra.mxu2 %vm484_vm10, %v727_v34  ;;  %1539 = vmatmul.msk.f32.gmra.mxu3 %vm484_vm10, %v931_v30  ;;  %v1247_v34 = vld [vmem:[%s2178_s4 + $0x8] sm:$0xff] }
  0xa9   : > { %1548 = vmatmul.msk.f32.gmra.mxu0 %vm484_vm10, %v1139_v32  ;;  %v1246_v32 = vld [vmem:[%s2178_s4] sm:$0xff] }
  0xaf   : > { %v1141_v37 = vpop.permute.xlu0 %1140 }
  0xb0   : > { %1540 = vmatmul.msk.f32.gmra.mxu3 %vm484_vm10, %v933_v35  ;;  %v1249_v35 = vld [vmem:[%s2178_s4 + $0x18] sm:$0xff] }
  0xb1   : > { %1549 = vmatmul.msk.f32.gmra.mxu0 %vm484_vm10, %v1141_v37 }
  0xb8   : > { %1541 = vmatmul.msk.f32.gmra.mxu3 %vm484_vm10, %v935_v38  ;;  %vm1390_vm10 = vcmask 60416  }
  0xc0   : > { %v1212_v23 = vpop.permute.xlu1 %1211 }
  0xcb   : > { %v1207_v4 = vpop.permute.xlu2 %1206  ;;  %v1202_v6 = vpop.permute.xlu1 %1201 }
  0xcd   : > { %v557_v41 = vpop.f32.mrf.mxu1 }
  0xd3   : > { %v1231_v10 = vpop.permute.xlu2 %1230  ;;  %v1197_v7 = vpop.permute.xlu1 %1196 }
  0xd5   : > { %v560_v5 = vpop.f32.mrf.mxu1 }
  0xdb   : > { %v1226_v15 = vpop.permute.xlu2 %1225 }
  0xdd   : > { %v563_v42 = vpop.f32.mrf.mxu1 }
  0xdf   : > { %v1318_v37 = vpop.permute.xlu1 %1317 }
  0xe0   : > { %v1236_v31 = vpop.permute.xlu0 %1235 }
  0xe3   : > { %v1313_v39 = vpop.permute.xlu2 %1312 }
  0xe8   : > { %v1221_v24 = vpop.permute.xlu0 %1220 }
 0x100   : > { %v756_v43 = vpop.f32.mrf.mxu2 }
 0x105   : > { %v514_v61 = vpop.f32.mrf.mxu0 }
 0x10b   : > { %v517_v29 = vpop.f32.mrf.mxu3 }
 0x10c   : > { %v558_v27 = vadd.f32 %v557_v41, %v517_v29 }
 0x10d   : > { %v554_v58 = vpop.f32.mrf.mxu0 }
 0x10e   : > { %v555_v55 = vadd.f32 %v554_v58, %v514_v61  ;;  %v1342_v61 = vpop.permute.xlu0 %1341  ;;  %v1337_v58 = vpop.permute.xlu2 %1336 }
 0x110   : > { %v768_v33 = vadd.f32 %v756_v43, %v555_v55 }
 0x113   : > { %v520_v20 = vpop.f32.mrf.mxu3 }
 0x114   : > { %v561_v53 = vadd.f32 %v560_v5, %v520_v20  ;;  %v1308_v20 = vpop.permute.xlu1 %1307 }
 0x116   : > { %v1170_v45 = vpop.f32.mrf.mxu0 }
 0x11b   : > { %v523_v44 = vpop.f32.mrf.mxu3  ;;  %v759_v46 = vpop.f32.mrf.mxu2 }
 0x11c   : > { %v769_v56 = vadd.f32 %v759_v46, %v558_v27  ;;  %v564_v9 = vadd.f32 %v563_v42, %v523_v44  ;;  %v1303_v46 = vpop.permute.xlu0 %1302  ;;  %v1352_v27 = vld [vmem:[%s2179_s5] sm:$0xf] }
 0x11e   : > { %v1173_v50 = vpop.f32.mrf.mxu0 }
 0x123   : > { %v964_v48 = vpop.f32.mrf.mxu3  ;;  %v762_v59 = vpop.f32.mrf.mxu2 }
 0x124   : > { %v770_v0 = vadd.f32 %v762_v59, %v561_v53  ;;  %v976_v40 = vadd.f32 %v964_v48, %v768_v33  ;;  %v1327_v59 = vpop.permute.xlu2 %1326 }
 0x126   : > { %v1176_v52 = vpop.f32.mrf.mxu0  ;;  %v1182_v17 = vadd.f32 %v1170_v45, %v976_v40 }
 0x128   : > { %v1214_v21 = vmul.f32 %v1197_v7, %v1182_v17 }
 0x12a   : > { %v1238_v25 = vadd.f32 %v1221_v24, %v1214_v21 }
 0x12b   : > { %v967_v51 = vpop.f32.mrf.mxu3  ;;  %v765_v8 = vpop.f32.mrf.mxu2 }
 0x12c   : > { %v977_v62 = vadd.f32 %v967_v51, %v769_v56  ;;  %v771_v47 = vadd.f32 %v765_v8, %v564_v9  ;;  %v1332_v51 = vpop.permute.xlu1 %1331 }
 0x12e   : > { %v1179_v13 = vpop.f32.mrf.mxu0  ;;  %v1183_v14 = vadd.f32 %v1173_v50, %v977_v62 }
 0x130   : > { %v1215_v60 = vmul.f32 %v1202_v6, %v1183_v14 }
 0x132   : > { %v1239_v2 = vadd.f32 %v1226_v15, %v1215_v60 }
 0x133   : > { %v970_v54 = vpop.f32.mrf.mxu3 }
 0x134   : > { %v978_v57 = vadd.f32 %v970_v54, %v770_v0  ;;  %v1381_v0 = vpop.permute.xlu0 %1380 }
 0x136   : > { %v1184_v11 = vadd.f32 %v1176_v52, %v978_v57  ;;  %v1387_v57 = vpop.permute.xlu1 %1386 }
 0x138   : > { %v1216_v18 = vmul.f32 %v1207_v4, %v1184_v11 }
 0x13a   : > { %v1240_v49 = vadd.f32 %v1231_v10, %v1216_v18 }
 0x13b   : > { %v973_v12 = vpop.f32.mrf.mxu3 }
 0x13c   : > { %v979_v16 = vadd.f32 %v973_v12, %v771_v47 }
 0x13e   : > { %v1185_v19 = vadd.f32 %v1179_v13, %v979_v16 }
 0x140   : > { %v1217_v1 = vmul.f32 %v1212_v23, %v1185_v19 }
 0x142   : > { %v1241_v22 = vadd.f32 %v1236_v31, %v1217_v1 }
 0x144   : > { %1631 = vtanh.f32 %v1241_v22 }
 0x145   : > { %1633 = vtanh.f32 %v1240_v49 }
 0x146   : > { %1635 = vtanh.f32 %v1239_v2 }
 0x147   : > { %1637 = vtanh.f32 %v1238_v25 }
 0x14a   : > { %v1632_v26 = vpop.eup %1631 }
 0x14b   : > { %1275 = vmatpush.msrb.mxu1 %v1632_v26  ;;  %v1634_v28 = vpop.eup %1633 }
 0x14c   : > { %v1636_v30 = vpop.eup %1635 }
 0x14d   : > { %1276 = vmatpush.msrb.mxu1 %v1634_v28  ;;  %v1638_v63 = vpop.eup %1637 }
 0x14f   : > { %1277 = vmatpush.msrb.mxu1 %v1636_v30 }
 0x151   : > { %1278 = vmatpush.msrb.mxu1 %v1638_v63 }
 0x152   : > { %1550 = vmatmul.msk.f32.vlgmr.msrb.gmra.mxu1 %vm1250_vm8, %v1246_v32 }
 0x15a   : > { %1551 = vmatmul.msk.f32.gmra.mxu1 %vm1250_vm8, %v1247_v34 }
 0x162   : > { %1552 = vmatmul.msk.f32.gmra.mxu1 %vm1250_vm8, %v1248_v3 }
 0x16a   : > { %1553 = vmatmul.msk.f32.gmra.mxu1 %vm1250_vm8, %v1249_v35 }
 0x1cf   : > { %v1280_v36 = vpop.f32.mrf.mxu1 }
 0x1d0   : > { %v1320_v48 = vmul.f32 %v1303_v46, %v1280_v36 }
 0x1d2   : > { %v1344_v4 = vadd.f32 %v1327_v59, %v1320_v48 }
 0x1d7   : > { %v1283_v38 = vpop.f32.mrf.mxu1 }
 0x1d8   : > { %v1321_v45 = vmul.f32 %v1308_v20, %v1283_v38 }
 0x1da   : > { %v1345_v23 = vadd.f32 %v1332_v51, %v1321_v45 }
 0x1df   : > { %v1286_v29 = vpop.f32.mrf.mxu1 }
 0x1e0   : > { %v1322_v43 = vmul.f32 %v1313_v39, %v1286_v29 }
 0x1e2   : > { %v1346_v50 = vadd.f32 %v1337_v58, %v1322_v43 }
 0x1e7   : > { %v1289_v44 = vpop.f32.mrf.mxu1 }
 0x1e8   : > { %v1323_v41 = vmul.f32 %v1318_v37, %v1289_v44 }
 0x1ea   : > { %v1347_v5 = vadd.f32 %v1342_v61, %v1323_v41 }
 0x1ec   : > { %1639 = vtanh.f32 %v1347_v5 }
 0x1ed   : > { %1641 = vtanh.f32 %v1346_v50 }
 0x1ee   : > { %1643 = vtanh.f32 %v1345_v23 }
 0x1ef   : > { %1645 = vtanh.f32 %v1344_v4 }
 0x1f2   : > { %v1640_v52 = vpop.eup %1639 }
 0x1f3   : > { %1368 = vmatpush.msrb.mxu2 %v1640_v52  ;;  %v1642_v53 = vpop.eup %1641 }
 0x1f4   : > { %v1644_v54 = vpop.eup %1643 }
 0x1f5   : > { %1369 = vmatpush.msrb.mxu2 %v1642_v53  ;;  %v1646_v55 = vpop.eup %1645 }
 0x1f7   : > { %1370 = vmatpush.msrb.mxu2 %v1644_v54 }
 0x1f9   : > { %1371 = vmatpush.msrb.mxu2 %v1646_v55 }
 0x1fa   : > { %1554 = vmatmul.msk.f32.vlgmr.msrb.gmra.mxu2 %vm1250_vm8, %v1352_v27 }
 0x27d   : > { %v1373_v42 = vpop.f32.mrf.mxu2 }
 0x27e   : > { %v1383_v56 = vmul.f32 %v1381_v0, %v1373_v42 }
 0x280   : > { %v1389_v6 = vadd.f32 %v1387_v57, %v1383_v56 }
 0x282   : > { %1391 = vst.msk [vmem:[%s294_s30] sm:$0xf] %vm1390_vm10, %v1389_v6 }
 0x283   : > { %1674 = shalt.err (!%p1671_p5)
}
 0x284   : > { %1562 = dma.vmem_to_hbm [thread:$0]  (%p1813_p4), %s1407_s8, 64, %s1409_s11, %s1393_s12  }
 0x285 PF: > { %p1568_p6 = scmp.ge.s32.totalorder %s1725_s26, 2  ;;  %s1420_s18 = sand.u32 1, %s1705_s21  }
 0x286   : > { %s1421_s27 = scalar_lea.sflag [#allocation3], %s1420_s18 }
 0x287   : > { %p1565_p7 = pnand %p1568_p6, %p1820_p8 }
 0x289   : > { %p1566_p9 = pneg %p1565_p7 }
 0x28b   : > { %1700 = dma.done.wait (%p1566_p9), %s1421_s27, 64  }
 0x28c   : > { %1702 = vsyncadd (%p1566_p9), %s1421_s27, 4294967232  ;;  %s19_s26 = sadd.s32 1, %s1725_s26   ;;  %s2187_s21 = smov %s1709_s22 }
 0x28d   : > { %p16_p10 = scmp.ge.s32.totalorder %s19_s26, 4   ;;  %s2188_s22 = smov %s1713_s23 }
 0x28e   : > { %s2189_s23 = smov %s1826_s10  ;;  %s2190_s24 = smov %s1721_s25 }
 0x28f   : > { %s2191_s25 = smov %s2193_s29  ;;  %18 = sbr.rel (!%p16_p10) target bundleno = 4 (0x4), region = 85 }
 0x294   :  { %1427 = vsyncpa [#allocation3], 1 }
 0x295   :  { %1429 = vsyncpa [#allocation3 + $0x1], 1 }

</bundles_post_ra>
